<compile_context>
chip_gen: v6e
topology: v6e:2x2x1
jax: 0.10.0
libtpu: 0.0.40
codegen_flags: <defaults>
</compile_context>

<pallas_src>
import functools

import jax
import jax.numpy as jnp
from jax import lax
from jax.experimental import pallas as pl
from jax.experimental.pallas import tpu as pltpu


C_PAD = 128      # per-head channel width padded to one full lane tile
H_PAD = 8        # head axis padded to one sublane tile for the logit arrays
NEG_BIG = -1e30  # "masked" logit value; exp underflows exactly to 0


def _round_up(v, m):
    return (v + m - 1) // m * m


def _vmem_capacity_bytes():
    """Per-generation VMEM capacity; conservative v7x fallback if unavailable."""
    try:
        info = pltpu.get_tpu_info()
        cap = getattr(info, "vmem_capacity_bytes", None)
        if cap:
            return int(cap)
    except Exception:
        pass
    return 64 * 1024 * 1024


# ---------------------------------------------------------------------------
# Kernel 1: linear projection + all attention logits, tiled over node rows.
# ---------------------------------------------------------------------------
def _project_kernel(x_ref, w_ref, asrc_ref, adst_ref,
                    h_ref, asrcT_ref, adstN_ref):
    # bf16 inputs, f32 accumulation on the MXU.
    h = jnp.dot(x_ref[...], w_ref[...],
                preferred_element_type=jnp.float32)              # [T, H*C_PAD] f32

    # All per-node attention logits for every head at once, in both roles.
    # Contracting on the feature axis of both operands yields a_src^T directly
    # in [H_PAD, T] (lane = source node) orientation — no XLU transpose later.
    dn = (((1,), (1,)), ((), ()))
    asrcT_ref[...] = lax.dot_general(asrc_ref[...], h, dn,
                                     preferred_element_type=jnp.float32)  # [H_PAD, T]
    adstN_ref[...] = lax.dot_general(h, adst_ref[...], dn,
                                     preferred_element_type=jnp.float32)  # [T, H_PAD]

    h_ref[...] = h.astype(h_ref.dtype)                           # bf16, head-blocked


# ---------------------------------------------------------------------------
# Kernel 2: online-softmax + per-head aggregation over (dst tile, src tile).
# ---------------------------------------------------------------------------
def _attn_agg_kernel(a_dst_ref, a_srcT_ref, adj_ref, h_ref, bias_ref, out_ref,
                     m_sc, l_sc, acc_sc, *, heads, negative_slope, n_valid):
    k = pl.program_id(1)
    nk = pl.num_programs(1)
    t_d, t_s = adj_ref.shape
    row0 = pl.program_id(0) * t_d
    col0 = k * t_s

    @pl.when(k == 0)
    def _init():
        m_sc[...] = jnp.full_like(m_sc, NEG_BIG)
        l_sc[...] = jnp.zeros_like(l_sc)
        acc_sc[...] = jnp.zeros_like(acc_sc)

    # Skip fully-padded destination tiles and fully-padded source column tiles.
    @pl.when(jnp.logical_and(row0 < n_valid, col0 < n_valid))
    def _compute():
        mask = adj_ref[...] > 0                                  # [T_D, T_S] (int8 in)
        a_dst = a_dst_ref[...]                                   # [T_D, H_PAD] f32
        a_srcT = a_srcT_ref[...]                                 # [H_PAD, T_S] f32
        h_blk = h_ref[...]                                       # [T_S, H*C_PAD] bf16

        for hh in range(heads):                                  # heads: small & static
            e = a_dst[:, hh:hh + 1] + a_srcT[hh:hh + 1, :]       # [T_D, T_S]
            e = jnp.where(e > 0, e, negative_slope * e)          # LeakyReLU(0.2)
            e = jnp.where(mask, e, NEG_BIG)                      # single masking pass

            m_prev = m_sc[:, hh:hh + 1]                          # [T_D, 1]
            m_new = jnp.maximum(m_prev, jnp.max(e, axis=-1, keepdims=True))
            corr = jnp.exp(m_prev - m_new)                       # rescale old state
            p = jnp.exp(e - m_new)                               # un-normalized probs
            # NOTE: a block whose rows are fully masked contributes p == 1,
            # but the exp(NEG_BIG - finite) correction factor wipes that state
            # as soon as a real edge (always incl. the self loop) is seen.
            l_sc[:, hh:hh + 1] = (corr * l_sc[:, hh:hh + 1]
                                  + jnp.sum(p, axis=-1, keepdims=True))
            acc_sc[:, hh * C_PAD:(hh + 1) * C_PAD] = (
                corr * acc_sc[:, hh * C_PAD:(hh + 1) * C_PAD]
                + jnp.dot(p.astype(jnp.bfloat16),
                          h_blk[:, hh * C_PAD:(hh + 1) * C_PAD],
                          preferred_element_type=jnp.float32))   # [T_D, C_PAD]
            m_sc[:, hh:hh + 1] = m_new

    @pl.when(k == nk - 1)
    def _finalize():
        valid = row0 < n_valid

        @pl.when(valid)
        def _store():
            # Deferred normalization: one [T_D, C_PAD] scale per head (EUP vrcp).
            out = jnp.zeros((t_d, C_PAD), jnp.float32)
            for hh in range(heads):
                inv_l = pl.reciprocal(l_sc[:, hh:hh + 1], approx=True)
                out = out + acc_sc[:, hh * C_PAD:(hh + 1) * C_PAD] * inv_l
            out = out * jnp.float32(1.0 / heads) + bias_ref[...]
            out_ref[...] = out.astype(out_ref.dtype)             # lane-dense [T_D, 128]

        @pl.when(jnp.logical_not(valid))
        def _zeros():
            out_ref[...] = jnp.zeros_like(out_ref)


# ---------------------------------------------------------------------------
# Tile choosers (account for double buffering, scratch and f32 temporaries).
# ---------------------------------------------------------------------------
def _choose_attn_tiles(n, heads, budget_bytes):
    """Pick square (T_D, T_S) tiles for kernel 2 and the matching n_pad."""
    n_min = max(128, _round_up(n, 128))
    hcp = heads * C_PAD
    chosen = 128
    for cand in (512, 256, 128):
        if cand > n_min:
            continue
        streamed = (2 * cand * cand                  # int8 adjacency (2 buffers)
                    + 2 * cand * hcp * 2             # h bf16 block
                    + 2 * cand * H_PAD * 4           # a_dst block
                    + 2 * H_PAD * cand * 4           # a_src^T block
                    + 2 * C_PAD * 4                  # bias
                    + 2 * cand * C_PAD * 4)          # output block
        scratch = cand * hcp * 4 + 2 * cand * H_PAD * 4
        temps = 8 * cand * cand * 4                  # e / p / mask f32 working set
        if streamed + scratch + temps <= budget_bytes:
            chosen = cand
            break
    n_pad = _round_up(n_min, chosen)
    return chosen, chosen, n_pad


def _choose_proj_tile(n_pad, f_in, heads, budget_bytes):
    """Pick the node-row tile for kernel 1 (must divide n_pad)."""
    hcp = heads * C_PAD
    chosen = 128
    for cand in (1024, 512, 256, 128):
        if n_pad % cand:
            continue
        per_row = (2 * f_in * 2           # x bf16 block (2 buffers)
                   + 2 * hcp * 2          # h out bf16 block
                   + 2 * 2 * H_PAD * 4    # a_src^T / a_dst out blocks
                   + 3 * hcp * 4)         # f32 h + dot_general temporaries
        resident = 2 * (f_in * hcp * 2 + 2 * H_PAD * hcp * 4)
        if resident + cand * per_row <= budget_bytes:
            chosen = cand
            break
    return chosen


# ---------------------------------------------------------------------------
# Wrapper: mirrors PNANN.forward(data) -> (x_new, edge_index, edge_attr).
# ---------------------------------------------------------------------------
def gat_conv_forward(x, edge_index, edge_attr, params, *, heads, out_c,
                     negative_slope=0.2):
    n, f_in = x.shape
    assert heads <= H_PAD, "heads must fit the padded head axis"
    hcp = heads * C_PAD

    vmem_cap = _vmem_capacity_bytes()
    vmem_limit = min(int(vmem_cap * 3 // 4), 100 * 1024 * 1024)
    budget = max(vmem_limit - 6 * 1024 * 1024, 16 * 1024 * 1024)

    t_d, t_s, n_pad = _choose_attn_tiles(n, heads, budget)
    tile_n = _choose_proj_tile(n_pad, f_in, heads, budget)

    # ---- plain-JAX glue: padding + dense int8 adjacency (+ self loops) ------
    x_pad = jnp.zeros((n_pad, f_in), jnp.bfloat16).at[:n].set(
        x.astype(jnp.bfloat16))

    src, dst = edge_index[0], edge_index[1]
    adj = jnp.zeros((n_pad, n_pad), jnp.int8)
    adj = adj.at[dst, src].set(1)                        # edge j -> i : adj[i, j] = 1
    adj = adj.at[jnp.arange(n), jnp.arange(n)].set(1)    # add_self_loops=True

    # Per-head channel padding (C -> C_PAD) and block-diagonal attention maps.
    w = params["w"].astype(jnp.float32).reshape(f_in, heads, out_c)
    w_pad = jnp.zeros((f_in, heads, C_PAD), jnp.float32).at[:, :, :out_c].set(w)
    w_pad = w_pad.reshape(f_in, hcp).astype(jnp.bfloat16)

    hh_idx = jnp.arange(heads)
    a_src_bd = jnp.zeros((H_PAD, heads, C_PAD), jnp.float32)
    a_src_bd = a_src_bd.at[hh_idx, hh_idx, :out_c].set(
        params["att_src"].astype(jnp.float32)).reshape(H_PAD, hcp)
    a_dst_bd = jnp.zeros((H_PAD, heads, C_PAD), jnp.float32)
    a_dst_bd = a_dst_bd.at[hh_idx, hh_idx, :out_c].set(
        params["att_dst"].astype(jnp.float32)).reshape(H_PAD, hcp)

    bias_pad = jnp.zeros((1, C_PAD), jnp.float32).at[:, :out_c].set(
        params["bias"].astype(jnp.float32))

    # ---- kernel 1: projection + per-node attention logits (row-tiled) -------
    proj_grid = pltpu.PrefetchScalarGridSpec(
        num_scalar_prefetch=0,
        grid=(n_pad // tile_n,),
        in_specs=[
            pl.BlockSpec((tile_n, f_in), lambda i: (i, 0)),     # x rows (bf16)
            pl.BlockSpec((f_in, hcp), lambda i: (0, 0)),        # W (resident)
            pl.BlockSpec((H_PAD, hcp), lambda i: (0, 0)),       # att_src (resident)
            pl.BlockSpec((H_PAD, hcp), lambda i: (0, 0)),       # att_dst (resident)
        ],
        out_specs=(
            pl.BlockSpec((tile_n, hcp), lambda i: (i, 0)),      # h (bf16, head-blocked)
            pl.BlockSpec((H_PAD, tile_n), lambda i: (0, i)),    # a_src^T
            pl.BlockSpec((tile_n, H_PAD), lambda i: (i, 0)),    # a_dst
        ),
    )
    h_bf16, a_srcT, a_dstN = pl.pallas_call(
        _project_kernel,
        out_shape=(
            jax.ShapeDtypeStruct((n_pad, hcp), jnp.bfloat16),
            jax.ShapeDtypeStruct((H_PAD, n_pad), jnp.float32),
            jax.ShapeDtypeStruct((n_pad, H_PAD), jnp.float32),
        ),
        grid_spec=proj_grid,
        compiler_params=pltpu.CompilerParams(
            dimension_semantics=("parallel",),
            vmem_limit_bytes=vmem_limit),
    )(x_pad, w_pad, a_src_bd, a_dst_bd)

    # ---- kernel 2: online softmax + aggregation over (dst, src) tiles -------
    n_d, n_k = n_pad // t_d, n_pad // t_s
    attn_grid = pltpu.PrefetchScalarGridSpec(
        num_scalar_prefetch=0,
        grid=(n_d, n_k),
        in_specs=[
            pl.BlockSpec((t_d, H_PAD), lambda i, k: (i, 0)),    # a_dst tile
            pl.BlockSpec((H_PAD, t_s), lambda i, k: (0, k)),    # a_src^T column tile
            pl.BlockSpec((t_d, t_s), lambda i, k: (i, k)),      # int8 adjacency block
            pl.BlockSpec((t_s, hcp), lambda i, k: (k, 0)),      # h row block (bf16)
            pl.BlockSpec((1, C_PAD), lambda i, k: (0, 0)),      # bias
        ],
        out_specs=pl.BlockSpec((t_d, C_PAD), lambda i, k: (i, 0)),
        scratch_shapes=[
            pltpu.VMEM((t_d, H_PAD), jnp.float32),              # running max m
            pltpu.VMEM((t_d, H_PAD), jnp.float32),              # running denom l
            pltpu.VMEM((t_d, hcp), jnp.float32),                # per-head accumulators
        ],
    )
    cost = pl.CostEstimate(
        flops=2 * heads * n_pad * n_pad * C_PAD + 12 * heads * n_pad * n_pad,
        transcendentals=heads * n_pad * n_pad,
        bytes_accessed=(n_pad * n_pad                                  # int8 adj
                        + n_d * (n_pad * hcp * 2 + H_PAD * n_pad * 4)  # h / a_src^T restream
                        + n_pad * H_PAD * 4 + n_pad * C_PAD * 4),
    )
    out_pad = pl.pallas_call(
        functools.partial(_attn_agg_kernel, heads=heads,
                          negative_slope=negative_slope, n_valid=n),
        out_shape=jax.ShapeDtypeStruct((n_pad, C_PAD), x.dtype),
        grid_spec=attn_grid,
        compiler_params=pltpu.CompilerParams(
            dimension_semantics=("parallel", "arbitrary"),
            vmem_limit_bytes=vmem_limit),
        cost_estimate=cost,
    )(a_dstN, a_srcT, adj, h_bf16, bias_pad)

    x_new = out_pad[:n, :out_c]
    return x_new, edge_index, edge_attr


def init_params(key, in_c, out_c, heads):
    k1, k2, k3 = jax.random.split(key, 3)
    w = jax.random.normal(k1, (in_c, heads * out_c), jnp.float32) * 0.2
    att_src = jax.random.normal(k2, (heads, out_c), jnp.float32) * 0.2
    att_dst = jax.random.normal(k3, (heads, out_c), jnp.float32) * 0.2
    bias = jnp.zeros((1, out_c), jnp.float32)
    return {"w": w, "att_src": att_src, "att_dst": att_dst, "bias": bias}


def _reference(x, edge_index, params, heads, out_c, neg=0.2):
    """Pure-JAX f32 reference (same semantics, exact softmax / f32 matmuls)."""
    n = x.shape[0]
    src, dst = edge_index[0], edge_index[1]
    adj = jnp.zeros((n, n), jnp.float32).at[dst, src].set(1.0)
    adj = adj.at[jnp.arange(n), jnp.arange(n)].set(1.0)
    h = x @ params["w"]
    acc = jnp.zeros((n, out_c), jnp.float32)
    for hh in range(heads):
        h_h = h[:, hh * out_c:(hh + 1) * out_c]
        a_s = h_h @ params["att_src"][hh]
        a_d = h_h @ params["att_dst"][hh]
        e = a_d[:, None] + a_s[None, :]
        e = jnp.where(e > 0, e, neg * e)
        e = jnp.where(adj > 0, e, -jnp.inf)
        alpha = jax.nn.softmax(e, axis=-1)
        acc = acc + alpha @ h_h
    return acc / heads + params["bias"]


if __name__ == "__main__":
    N, IN_C, OUT_C, HEADS = 16, 8, 16, 4
    NUM_EDGE_FEATS = 3

    key = jax.random.PRNGKey(0)
    kx, kp, ke = jax.random.split(key, 3)

    x = jax.random.normal(kx, (N, IN_C), jnp.float32)

    # deterministic ring graph (both directions): 2N edges
    idx = jnp.arange(N)
    src = jnp.concatenate([idx, (idx + 1) % N])
    dst = jnp.concatenate([(idx + 1) % N, idx])
    edge_index = jnp.stack([src, dst]).astype(jnp.int32)           # [2, E]
    edge_attr = jax.random.normal(ke, (edge_index.shape[1], NUM_EDGE_FEATS),
                                  jnp.float32)                     # passthrough

    params = init_params(kp, IN_C, OUT_C, HEADS)

    x_out, ei_out, ea_out = gat_conv_forward(
        x, edge_index, edge_attr, params, heads=HEADS, out_c=OUT_C)
    jax.block_until_ready(x_out)

    assert x_out.shape == (N, OUT_C)
    assert ei_out.shape == edge_index.shape
    assert ea_out.shape == edge_attr.shape

    ref = _reference(x, edge_index, params, HEADS, OUT_C)
    max_err = float(jnp.max(jnp.abs(x_out - ref)))
    # bf16 projection / aggregation operands + EUP approx reciprocal
    # => loosened tolerance (f32 accumulation is kept everywhere).
    assert jnp.allclose(x_out, ref, atol=5e-2, rtol=5e-2), max_err
    print("KERNEL_OK")
</pallas_src>

<mosaic_0001>
module attributes {stable_mosaic.version = 11 : i64} {
  func.func @_project_kernel(%arg0: i32, %arg1: memref<128x8xbf16, #tpu.memory_space<vmem>>, %arg2: memref<8x512xbf16, #tpu.memory_space<vmem>>, %arg3: memref<8x512xf32, #tpu.memory_space<vmem>>, %arg4: memref<8x512xf32, #tpu.memory_space<vmem>>, %arg5: memref<128x512xbf16, #tpu.memory_space<vmem>>, %arg6: memref<8x128xf32, #tpu.memory_space<vmem>>, %arg7: memref<128x8xf32, #tpu.memory_space<vmem>>) attributes {dimension_semantics = [#tpu.dimension_semantics<parallel>], iteration_bounds = array<i64: 1>, scalar_prefetch = 0 : i64, scratch_operands = 0 : i64, tpu.core_type = #tpu.core_type<tc>, window_params = [{transform_indices = @transform_0, window_bounds = array<i64: 128, 8>}, {pipeline_mode = #tpu.pipeline_mode<synchronous>, transform_indices = @transform_1, window_bounds = array<i64: 8, 512>}, {pipeline_mode = #tpu.pipeline_mode<synchronous>, transform_indices = @transform_2, window_bounds = array<i64: 8, 512>}, {pipeline_mode = #tpu.pipeline_mode<synchronous>, transform_indices = @transform_3, window_bounds = array<i64: 8, 512>}, {transform_indices = @transform_4, window_bounds = array<i64: 128, 512>}, {transform_indices = @transform_5, window_bounds = array<i64: 8, 128>}, {transform_indices = @transform_6, window_bounds = array<i64: 128, 8>}]} {
    %c0 = arith.constant 0 : index
    %c0_0 = arith.constant 0 : index
    %0 = vector.load %arg1[%c0, %c0_0] : memref<128x8xbf16, #tpu.memory_space<vmem>>, vector<128x8xbf16>
    %c0_1 = arith.constant 0 : index
    %c0_2 = arith.constant 0 : index
    %1 = vector.load %arg2[%c0_1, %c0_2] : memref<8x512xbf16, #tpu.memory_space<vmem>>, vector<8x512xbf16>
    %cst = arith.constant dense<0.000000e+00> : vector<128x512xf32>
    %2 = tpu.matmul %0, %1, %cst {dimension_numbers = #tpu.dot_dimension_numbers<[1], [0], [0], [1], [0, 0, 1, 1], [], []>} : vector<128x8xbf16>, vector<8x512xbf16>, vector<128x512xf32> -> vector<128x512xf32>
    %c0_3 = arith.constant 0 : index
    %c0_4 = arith.constant 0 : index
    %3 = vector.load %arg3[%c0_3, %c0_4] : memref<8x512xf32, #tpu.memory_space<vmem>>, vector<8x512xf32>
    %cst_5 = arith.constant dense<0.000000e+00> : vector<8x128xf32>
    %4 = tpu.matmul %3, %2, %cst_5 {dimension_numbers = #tpu.dot_dimension_numbers<[1], [1], [0], [0], [0, 0, 1, 0], [], []>} : vector<8x512xf32>, vector<128x512xf32>, vector<8x128xf32> -> vector<8x128xf32>
    %c0_6 = arith.constant 0 : index
    %c0_7 = arith.constant 0 : index
    %5 = vector.load %arg6[%c0_6, %c0_7] : memref<8x128xf32, #tpu.memory_space<vmem>>, vector<8x128xf32>
    tpu.vector_store %arg6[%c0_6, %c0_7], %4 {strides = array<i32>} : memref<8x128xf32, #tpu.memory_space<vmem>>, vector<8x128xf32>,
    %c0_8 = arith.constant 0 : index
    %c0_9 = arith.constant 0 : index
    %6 = vector.load %arg4[%c0_8, %c0_9] : memref<8x512xf32, #tpu.memory_space<vmem>>, vector<8x512xf32>
    %cst_10 = arith.constant dense<0.000000e+00> : vector<128x8xf32>
    %7 = tpu.matmul %2, %6, %cst_10 {dimension_numbers = #tpu.dot_dimension_numbers<[1], [1], [0], [0], [0, 0, 1, 0], [], []>} : vector<128x512xf32>, vector<8x512xf32>, vector<128x8xf32> -> vector<128x8xf32>
    %c0_11 = arith.constant 0 : index
    %c0_12 = arith.constant 0 : index
    %8 = vector.load %arg7[%c0_11, %c0_12] : memref<128x8xf32, #tpu.memory_space<vmem>>, vector<128x8xf32>
    tpu.vector_store %arg7[%c0_11, %c0_12], %7 {strides = array<i32>} : memref<128x8xf32, #tpu.memory_space<vmem>>, vector<128x8xf32>,
    %9 = arith.truncf %2 : vector<128x512xf32> to vector<128x512xbf16>
    %c0_13 = arith.constant 0 : index
    %c0_14 = arith.constant 0 : index
    %10 = vector.load %arg5[%c0_13, %c0_14] : memref<128x512xbf16, #tpu.memory_space<vmem>>, vector<128x512xbf16>
    tpu.vector_store %arg5[%c0_13, %c0_14], %9 {strides = array<i32>} : memref<128x512xbf16, #tpu.memory_space<vmem>>, vector<128x512xbf16>,
    return
  }
  func.func @transform_0(%arg0: i32) -> (i32, i32) {
    %c0_i32 = arith.constant 0 : i32
    %c0_i32_0 = arith.constant 0 : i32
    return %arg0, %c0_i32 : i32, i32
  }
  func.func @transform_1(%arg0: i32) -> (i32, i32) {
    %c0_i32 = arith.constant 0 : i32
    %c0_i32_0 = arith.constant 0 : i32
    %c0_i32_1 = arith.constant 0 : i32
    return %c0_i32, %c0_i32_0 : i32, i32
  }
  func.func @transform_2(%arg0: i32) -> (i32, i32) {
    %c0_i32 = arith.constant 0 : i32
    %c0_i32_0 = arith.constant 0 : i32
    %c0_i32_1 = arith.constant 0 : i32
    return %c0_i32, %c0_i32_0 : i32, i32
  }
  func.func @transform_3(%arg0: i32) -> (i32, i32) {
    %c0_i32 = arith.constant 0 : i32
    %c0_i32_0 = arith.constant 0 : i32
    %c0_i32_1 = arith.constant 0 : i32
    return %c0_i32, %c0_i32_0 : i32, i32
  }
  func.func @transform_4(%arg0: i32) -> (i32, i32) {
    %c0_i32 = arith.constant 0 : i32
    %c0_i32_0 = arith.constant 0 : i32
    return %arg0, %c0_i32 : i32, i32
  }
  func.func @transform_5(%arg0: i32) -> (i32, i32) {
    %c0_i32 = arith.constant 0 : i32
    %c0_i32_0 = arith.constant 0 : i32
    return %c0_i32, %arg0 : i32, i32
  }
  func.func @transform_6(%arg0: i32) -> (i32, i32) {
    %c0_i32 = arith.constant 0 : i32
    %c0_i32_0 = arith.constant 0 : i32
    return %arg0, %c0_i32 : i32, i32
  }
}

</mosaic_0001>

<bundles_post_ra>
// kernel: tpu_custom_call.1
= control target key start
LH: loop header
LB: loop body
LE: loop exit
PB: predicated region body
PF: predicated region fallthrough
CT: control target
= control target key end

     0   :  { %12 = vsyncpa [#allocation3], 0  ;;  %s1757_s0 = inlined_call_operand.vmem [shape: bf16[128,8], index: 0, kind: input, shape index: {}]   ;;  %s1758_s1 = inlined_call_operand.hbm [shape: bf16[8,512], index: 1, kind: input, shape index: {}]   ;;  %s1759_s2 = inlined_call_operand.vmem [shape: f32[8,512], index: 2, kind: input, shape index: {}]   ;;  %s1760_s3 = inlined_call_operand.vmem [shape: f32[8,512], index: 3, kind: input, shape index: {}]   ;;  %s1761_s4 = inlined_call_operand.hbm [shape: bf16[128,512], index: 4, kind: output, shape index: {0}]   ;;  %s1762_s5 = inlined_call_operand.hbm [shape: f32[8,128], index: 5, kind: output, shape index: {1}]   ;;  %s1763_s6 = inlined_call_operand.vmem [shape: f32[128,8], index: 6, kind: output, shape index: {2}]  }
   0x1   :  { %13 = vsyncpa [#allocation4], 0 }
   0x2   :  { %14 = vsyncpa [#allocation7], 0  ;;  %s1259_s21 = smov [#allocation2]  }
   0x3   :  { %s23_s22 = sshll.u32 %s1259_s21, 4  ;;  %s24_s22 = int_to_ptr.vmem [resolvable:$true] %s23_s22 }
   0x4   :  { %s1201_s23 = scalar_lea.vmem %s24_s22, 256  ;;  %p1206_p1 = scmp.lt.s32.totalorder %s24_s22, %s24_s22 }
   0x5   :  { %p1202_p0 = scmp.ne.s32.totalorder %s24_s22, %s1201_s23  ;;  %p1207_p2 = scmp.lt.s32.totalorder %s1201_s23, %s1201_s23 }
   0x7   :  { %p1208_p3 = por %p1207_p2, %p1206_p1 }
   0x9   :  { %p1209_p4 = pnand %p1208_p3, %p1202_p0 }
   0xb   :  { %1212 = shalt.err (!%p1209_p4)
}
   0xc   :  { %26 = dma.hbm_to_vmem [thread:$0]  %s1758_s1, 256, %s24_s22, [#allocation3]  }
   0xd   :  { %1253 = dma.done.wait [#allocation3], 256  }
   0xe   :  { %1254 = vsyncadd [#allocation3], 4294967040  ;;  %v1260_v0 = vmov 0   ;;  %v51_v1 = vld [vmem:[#allocation2] sm:$0xff]  ;;  %vm128_vm0 = vcmask 1043456   ;;  %v52_v2 = vld [vmem:[#allocation2 + $0x8] sm:$0xff] }
   0xf   :  { %173 = vmatprep.mubr.bf16.mxu0 %v1260_v0  ;;  %286 = vmatprep.mubr.bf16.mxu1 %v1260_v0  ;;  %v1090_v3 = vcombine.high %v51_v1, %v51_v1  ;;  %v1092_v4 = vcombine.high %v52_v2, %v52_v2  ;;  %v1089_v5 = vcombine.low %v51_v1, %v51_v1  ;;  %v1185_v9 = vld [vmem:[%s1757_s0] sm:$0xff]   ;;  %vm103_vm1 = vcmask 64512   ;;  %v1186_v10 = vld [vmem:[%s1757_s0 + $0x8] sm:$0xff]   ;;  %v1187_v11 = vld [vmem:[%s1757_s0 + $0x10] sm:$0xff]  }
  0x10   :  { %v1091_v6 = vcombine.low %v52_v2, %v52_v2  ;;  %v1188_v12 = vld [vmem:[%s1757_s0 + $0x18] sm:$0xff]   ;;  %v1189_v13 = vld [vmem:[%s1757_s0 + $0x20] sm:$0xff]   ;;  %v1190_v14 = vld [vmem:[%s1757_s0 + $0x28] sm:$0xff]  }
  0x11   :  { %1093 = vmatprep.subr.msk.bf16.mxu0 %vm128_vm0, %v1090_v3  ;;  %1102 = vmatprep.subr.msk.bf16.mxu1 %vm128_vm0, %v1092_v4  ;;  %v130_v7 = vsel %vm128_vm0, %v1089_v5, 0  ;;  %v1191_v15 = vld [vmem:[%s1757_s0 + $0x30] sm:$0xff]   ;;  %v1192_v16 = vld [vmem:[%s1757_s0 + $0x38] sm:$0xff]   ;;  %v368_v17 = vld [vmem:[%s1759_s2 + $0x8] sm:$0xff] }
  0x12   :  { %v136_v8 = vsel %vm128_vm0, %v1091_v6, 0  ;;  %156 = vmatpush1.bf16.msra.mxu0 %v130_v7  ;;  %v370_v18 = vld [vmem:[%s1759_s2 + $0x18] sm:$0xff] }
  0x13   :  { %269 = vmatpush1.bf16.msra.mxu1 %v136_v8 }
  0x15   :  { %1094 = vmatmul.mubr.msk.bf16.vlgmr.msra.gmra.mxu0 %vm103_vm1, %v1185_v9 }
  0x16   :  { %1103 = vmatmul.mubr.msk.bf16.vlgmr.msra.gmra.mxu1 %vm103_vm1, %v1185_v9  ;;  %183 = vmatprep.mubr.bf16.mxu0 %v1260_v0 }
  0x17   :  { %296 = vmatprep.mubr.bf16.mxu1 %v1260_v0 }
  0x1d   :  { %1095 = vmatmul.mubr.msk.bf16.gmra.mxu0 %vm103_vm1, %v1186_v10 }
  0x1e   :  { %1104 = vmatmul.mubr.msk.bf16.gmra.mxu1 %vm103_vm1, %v1186_v10  ;;  %193 = vmatprep.mubr.bf16.mxu0 %v1260_v0 }
  0x1f   :  { %306 = vmatprep.mubr.bf16.mxu1 %v1260_v0 }
  0x25   :  { %1096 = vmatmul.mubr.msk.bf16.gmra.mxu0 %vm103_vm1, %v1187_v11 }
  0x26   :  { %1105 = vmatmul.mubr.msk.bf16.gmra.mxu1 %vm103_vm1, %v1187_v11  ;;  %203 = vmatprep.mubr.bf16.mxu0 %v1260_v0 }
  0x27   :  { %316 = vmatprep.mubr.bf16.mxu1 %v1260_v0 }
  0x2d   :  { %1097 = vmatmul.mubr.msk.bf16.gmra.mxu0 %vm103_vm1, %v1188_v12 }
  0x2e   :  { %1106 = vmatmul.mubr.msk.bf16.gmra.mxu1 %vm103_vm1, %v1188_v12  ;;  %213 = vmatprep.mubr.bf16.mxu0 %v1260_v0 }
  0x2f   :  { %326 = vmatprep.mubr.bf16.mxu1 %v1260_v0 }
  0x35   :  { %1098 = vmatmul.mubr.msk.bf16.gmra.mxu0 %vm103_vm1, %v1189_v13 }
  0x36   :  { %1107 = vmatmul.mubr.msk.bf16.gmra.mxu1 %vm103_vm1, %v1189_v13  ;;  %223 = vmatprep.mubr.bf16.mxu0 %v1260_v0 }
  0x37   :  { %336 = vmatprep.mubr.bf16.mxu1 %v1260_v0 }
  0x3d   :  { %1099 = vmatmul.mubr.msk.bf16.gmra.mxu0 %vm103_vm1, %v1190_v14 }
  0x3e   :  { %1108 = vmatmul.mubr.msk.bf16.gmra.mxu1 %vm103_vm1, %v1190_v14  ;;  %233 = vmatprep.mubr.bf16.mxu0 %v1260_v0 }
  0x3f   :  { %346 = vmatprep.mubr.bf16.mxu1 %v1260_v0 }
  0x45   :  { %1100 = vmatmul.mubr.msk.bf16.gmra.mxu0 %vm103_vm1, %v1191_v15 }
  0x46   :  { %1109 = vmatmul.mubr.msk.bf16.gmra.mxu1 %vm103_vm1, %v1191_v15  ;;  %243 = vmatprep.mubr.bf16.mxu0 %v1260_v0 }
  0x47   :  { %356 = vmatprep.mubr.bf16.mxu1 %v1260_v0 }
  0x4d   :  { %1101 = vmatmul.mubr.msk.bf16.gmra.mxu0 %vm103_vm1, %v1192_v16 }
  0x4e   :  { %1110 = vmatmul.mubr.msk.bf16.gmra.mxu1 %vm103_vm1, %v1192_v16  ;;  %435 = vmatprep.mubr.f32.mxu0 %v368_v17 }
  0x4f   :  { %505 = vmatprep.mubr.f32.mxu1 %v370_v18 }
  0xd5   :  { %v1349_v19 = vpop.f32.mrf.mxu0 }
  0xd6   :  { %1778 = vst [vmem:[#allocation11_spill] sm:$0xff] %v1349_v19  ;;  %v1351_v20 = vpop.f32.mrf.mxu1 }
  0xd7   :  { %1779 = vst [vmem:[#allocation12_spill] sm:$0xff] %v1351_v20  ;;  %v1353_v21 = vpop.f32.mrf.mxu0 }
  0xd8   :  { %1780 = vst [vmem:[#allocation13_spill] sm:$0xff] %v1353_v21  ;;  %v1355_v22 = vpop.f32.mrf.mxu1  ;;  %v1143_v23 = vpack.c.bf16 %v1353_v21, %v1349_v19 }
  0xd9   :  { %1781 = vst [vmem:[#allocation14_spill] sm:$0xff] %v1355_v22  ;;  %v1144_v24 = vpack.c.bf16 %v1355_v22, %v1351_v20  ;;  %v1361_v25 = vpop.f32.mrf.mxu0 }
  0xda   :  { %v1363_v26 = vpop.f32.mrf.mxu1  ;;  %1014 = vst [vmem:[#allocation5] sm:$0xff] %v1143_v23 }
  0xdb   :  { %1015 = vst [vmem:[#allocation5 + $0x8] sm:$0xff] %v1144_v24  ;;  %v1365_v27 = vpop.f32.mrf.mxu0 }
  0xdc   :  { %v1367_v28 = vpop.f32.mrf.mxu1  ;;  %v1145_v29 = vpack.c.bf16 %v1365_v27, %v1361_v25 }
  0xdd   :  { %v1146_v30 = vpack.c.bf16 %v1367_v28, %v1363_v26  ;;  %v1373_v31 = vpop.f32.mrf.mxu0 }
  0xde   :  { %v1375_v32 = vpop.f32.mrf.mxu1  ;;  %1016 = vst [vmem:[#allocation5 + $0x10] sm:$0xff] %v1145_v29 }
  0xdf   :  { %1017 = vst [vmem:[#allocation5 + $0x18] sm:$0xff] %v1146_v30  ;;  %v1377_v33 = vpop.f32.mrf.mxu0 }
  0xe0   :  { %v1379_v34 = vpop.f32.mrf.mxu1  ;;  %v1147_v35 = vpack.c.bf16 %v1377_v33, %v1373_v31 }
  0xe1   :  { %v1148_v36 = vpack.c.bf16 %v1379_v34, %v1375_v32  ;;  %v1385_v37 = vpop.f32.mrf.mxu0 }
  0xe2   :  { %v1387_v38 = vpop.f32.mrf.mxu1  ;;  %1018 = vst [vmem:[#allocation5 + $0x20] sm:$0xff] %v1147_v35 }
  0xe3   :  { %1019 = vst [vmem:[#allocation5 + $0x28] sm:$0xff] %v1148_v36  ;;  %v1389_v39 = vpop.f32.mrf.mxu0 }
  0xe4   :  { %v1391_v40 = vpop.f32.mrf.mxu1  ;;  %v1149_v41 = vpack.c.bf16 %v1389_v39, %v1385_v37 }
  0xe5   :  { %v1150_v42 = vpack.c.bf16 %v1391_v40, %v1387_v38  ;;  %v1397_v43 = vpop.f32.mrf.mxu0 }
  0xe6   :  { %v1399_v44 = vpop.f32.mrf.mxu1  ;;  %1020 = vst [vmem:[#allocation5 + $0x30] sm:$0xff] %v1149_v41 }
  0xe7   :  { %1021 = vst [vmem:[#allocation5 + $0x38] sm:$0xff] %v1150_v42  ;;  %v1401_v45 = vpop.f32.mrf.mxu0 }
  0xe8   :  { %v1403_v46 = vpop.f32.mrf.mxu1  ;;  %v1151_v47 = vpack.c.bf16 %v1401_v45, %v1397_v43 }
  0xe9   :  { %v1152_v48 = vpack.c.bf16 %v1403_v46, %v1399_v44  ;;  %v1409_v49 = vpop.f32.mrf.mxu0 }
  0xea   :  { %v1411_v50 = vpop.f32.mrf.mxu1  ;;  %1022 = vst [vmem:[#allocation5 + $0x40] sm:$0xff] %v1151_v47 }
  0xeb   :  { %1023 = vst [vmem:[#allocation5 + $0x48] sm:$0xff] %v1152_v48  ;;  %v1413_v51 = vpop.f32.mrf.mxu0 }
  0xec   :  { %v1415_v52 = vpop.f32.mrf.mxu1  ;;  %v1153_v53 = vpack.c.bf16 %v1413_v51, %v1409_v49 }
  0xed   :  { %v1154_v54 = vpack.c.bf16 %v1415_v52, %v1411_v50  ;;  %v1421_v55 = vpop.f32.mrf.mxu0 }
  0xee   :  { %v1423_v56 = vpop.f32.mrf.mxu1  ;;  %1024 = vst [vmem:[#allocation5 + $0x50] sm:$0xff] %v1153_v53 }
  0xef   :  { %1025 = vst [vmem:[#allocation5 + $0x58] sm:$0xff] %v1154_v54  ;;  %v1425_v57 = vpop.f32.mrf.mxu0 }
  0xf0   :  { %v1427_v58 = vpop.f32.mrf.mxu1  ;;  %v1155_v59 = vpack.c.bf16 %v1425_v57, %v1421_v55 }
  0xf1   :  { %v1156_v60 = vpack.c.bf16 %v1427_v58, %v1423_v56  ;;  %v1433_v61 = vpop.f32.mrf.mxu0 }
  0xf2   :  { %v1435_v62 = vpop.f32.mrf.mxu1  ;;  %1026 = vst [vmem:[#allocation5 + $0x60] sm:$0xff] %v1155_v59 }
  0xf3   :  { %1027 = vst [vmem:[#allocation5 + $0x68] sm:$0xff] %v1156_v60  ;;  %v1437_v63 = vpop.f32.mrf.mxu0 }
  0xf4   :  { %v1439_v0 = vpop.f32.mrf.mxu1  ;;  %v1157_v1 = vpack.c.bf16 %v1437_v63, %v1433_v61 }
  0xf5   :  { %v1158_v2 = vpack.c.bf16 %v1439_v0, %v1435_v62  ;;  %v1445_v3 = vpop.f32.mrf.mxu0 }
  0xf6   :  { %v1447_v4 = vpop.f32.mrf.mxu1  ;;  %1028 = vst [vmem:[#allocation5 + $0x70] sm:$0xff] %v1157_v1 }
  0xf7   :  { %1029 = vst [vmem:[#allocation5 + $0x78] sm:$0xff] %v1158_v2  ;;  %v1449_v5 = vpop.f32.mrf.mxu0 }
  0xf8   :  { %v1451_v6 = vpop.f32.mrf.mxu1  ;;  %v1159_v7 = vpack.c.bf16 %v1449_v5, %v1445_v3 }
  0xf9   :  { %v1160_v8 = vpack.c.bf16 %v1451_v6, %v1447_v4  ;;  %v1457_v9 = vpop.f32.mrf.mxu0 }
  0xfa   :  { %v1459_v10 = vpop.f32.mrf.mxu1  ;;  %1030 = vst [vmem:[#allocation5 + $0x80] sm:$0xff] %v1159_v7 }
  0xfb   :  { %1031 = vst [vmem:[#allocation5 + $0x88] sm:$0xff] %v1160_v8  ;;  %v1461_v11 = vpop.f32.mrf.mxu0 }
  0xfc   :  { %v1463_v12 = vpop.f32.mrf.mxu1  ;;  %v1161_v13 = vpack.c.bf16 %v1461_v11, %v1457_v9 }
  0xfd   :  { %v1162_v14 = vpack.c.bf16 %v1463_v12, %v1459_v10  ;;  %v1469_v15 = vpop.f32.mrf.mxu0 }
  0xfe   :  { %v1471_v16 = vpop.f32.mrf.mxu1  ;;  %1032 = vst [vmem:[#allocation5 + $0x90] sm:$0xff] %v1161_v13 }
  0xff   :  { %1033 = vst [vmem:[#allocation5 + $0x98] sm:$0xff] %v1162_v14  ;;  %v1473_v17 = vpop.f32.mrf.mxu0 }
 0x100   :  { %v1475_v18 = vpop.f32.mrf.mxu1  ;;  %v1163_v23 = vpack.c.bf16 %v1473_v17, %v1469_v15 }
 0x101   :  { %v1164_v24 = vpack.c.bf16 %v1475_v18, %v1471_v16  ;;  %v1481_v29 = vpop.f32.mrf.mxu0 }
 0x102   :  { %v1483_v30 = vpop.f32.mrf.mxu1  ;;  %1034 = vst [vmem:[#allocation5 + $0xa0] sm:$0xff] %v1163_v23 }
 0x103   :  { %1035 = vst [vmem:[#allocation5 + $0xa8] sm:$0xff] %v1164_v24  ;;  %v1485_v35 = vpop.f32.mrf.mxu0 }
 0x104   :  { %v1487_v36 = vpop.f32.mrf.mxu1  ;;  %v1165_v41 = vpack.c.bf16 %v1485_v35, %v1481_v29 }
 0x105   :  { %v1166_v42 = vpack.c.bf16 %v1487_v36, %v1483_v30  ;;  %v1493_v47 = vpop.f32.mrf.mxu0 }
 0x106   :  { %v1495_v48 = vpop.f32.mrf.mxu1  ;;  %1036 = vst [vmem:[#allocation5 + $0xb0] sm:$0xff] %v1165_v41 }
 0x107   :  { %1037 = vst [vmem:[#allocation5 + $0xb8] sm:$0xff] %v1166_v42  ;;  %v1497_v53 = vpop.f32.mrf.mxu0 }
 0x108   :  { %v1499_v54 = vpop.f32.mrf.mxu1  ;;  %v1167_v59 = vpack.c.bf16 %v1497_v53, %v1493_v47 }
 0x109   :  { %v1168_v60 = vpack.c.bf16 %v1499_v54, %v1495_v48  ;;  %v1505_v1 = vpop.f32.mrf.mxu0 }
 0x10a   :  { %v1507_v2 = vpop.f32.mrf.mxu1  ;;  %1038 = vst [vmem:[#allocation5 + $0xc0] sm:$0xff] %v1167_v59 }
 0x10b   :  { %1039 = vst [vmem:[#allocation5 + $0xc8] sm:$0xff] %v1168_v60  ;;  %v1509_v7 = vpop.f32.mrf.mxu0 }
 0x10c   :  { %v1511_v8 = vpop.f32.mrf.mxu1  ;;  %v1169_v13 = vpack.c.bf16 %v1509_v7, %v1505_v1 }
 0x10d   :  { %v1170_v14 = vpack.c.bf16 %v1511_v8, %v1507_v2  ;;  %v1517_v23 = vpop.f32.mrf.mxu0 }
 0x10e   :  { %1782 = vst [vmem:[#allocation15_spill] sm:$0xff] %v1517_v23  ;;  %v1519_v24 = vpop.f32.mrf.mxu1  ;;  %1040 = vst [vmem:[#allocation5 + $0xd0] sm:$0xff] %v1169_v13 }
 0x10f   :  { %1783 = vst [vmem:[#allocation16_spill] sm:$0xff] %v1519_v24  ;;  %1041 = vst [vmem:[#allocation5 + $0xd8] sm:$0xff] %v1170_v14  ;;  %v1521_v41 = vpop.f32.mrf.mxu0 }
 0x110   :  { %v1523_v42 = vpop.f32.mrf.mxu1  ;;  %v1171_v59 = vpack.c.bf16 %v1521_v41, %v1517_v23 }
 0x111   :  { %v1172_v60 = vpack.c.bf16 %v1523_v42, %v1519_v24  ;;  %v1529_v20 = vpop.f32.mrf.mxu0 }
 0x112   :  { %1784 = vst [vmem:[#allocation17_spill] sm:$0xff] %v1529_v20  ;;  %v1531_v19 = vpop.f32.mrf.mxu1  ;;  %1042 = vst [vmem:[#allocation5 + $0xe0] sm:$0xff] %v1171_v59  ;;  %v1789_v59 = vld [vmem:[#allocation14_spill] sm:$0xff] }
 0x113   :  { %1785 = vst [vmem:[#allocation18_spill] sm:$0xff] %v1531_v19  ;;  %1043 = vst [vmem:[#allocation5 + $0xe8] sm:$0xff] %v1172_v60  ;;  %v1533_v22 = vpop.f32.mrf.mxu0  ;;  %v513_v60 = vld [vmem:[%s1760_s3 + $0x8] sm:$0xff] }
 0x114   :  { %1786 = vst [vmem:[#allocation19_spill] sm:$0xff] %v1533_v22  ;;  %v1535_v13 = vpop.f32.mrf.mxu1  ;;  %v1173_v14 = vpack.c.bf16 %v1533_v22, %v1529_v20  ;;  %371 = vmatprep.subr.mxu0 %v1533_v22  ;;  %v369_v22 = vld [vmem:[%s1759_s2 + $0x10] sm:$0xff] }
 0x115   :  { %1787 = vst [vmem:[#allocation20_spill] sm:$0xff] %v1535_v13  ;;  %v1174_v21 = vpack.c.bf16 %v1535_v13, %v1531_v19  ;;  %441 = vmatprep.subr.mxu1 %v1535_v13  ;;  %372 = vmatpush1.xpose.msra.mxu0 %v1529_v20  ;;  %v1791_v20 = vld [vmem:[#allocation12_spill] sm:$0xff] }
 0x116   :  { %442 = vmatpush1.xpose.msra.mxu1 %v1531_v19  ;;  %1044 = vst [vmem:[#allocation5 + $0xf0] sm:$0xff] %v1173_v14  ;;  %373 = vmatprep.subr.mxu0 %v1521_v41  ;;  %v515_v14 = vld [vmem:[%s1760_s3 + $0x18] sm:$0xff]  ;;  %v367_v13 = vld [vmem:[%s1759_s2] sm:$0xff]  ;;  %s1261_s2 = smov [#allocation5]  }
 0x117   :  { %1045 = vst [vmem:[#allocation5 + $0xf8] sm:$0xff] %v1174_v21  ;;  %443 = vmatprep.subr.mxu1 %v1523_v42  ;;  %v1788_v21 = vld [vmem:[#allocation13_spill] sm:$0xff]  ;;  %v1790_v19 = vld [vmem:[#allocation11_spill] sm:$0xff] }
 0x119   :  { %374 = vmatpush1.xpose.msra.mxu0 %v1517_v23  ;;  %v514_v23 = vld [vmem:[%s1760_s3 + $0x10] sm:$0xff] }
 0x11a   :  { %444 = vmatpush1.xpose.msra.mxu1 %v1519_v24  ;;  %375 = vmatprep.subr.mxu0 %v1509_v7  ;;  %v512_v24 = vld [vmem:[%s1760_s3] sm:$0xff]  ;;  %s1051_s3 = sshll.u32 %s1261_s2, 4  ;;  %s1052_s3 = int_to_ptr.vmem [resolvable:$true] %s1051_s3 }
 0x11b   :  { %445 = vmatprep.subr.mxu1 %v1511_v8  ;;  %s1213_s7 = scalar_lea.vmem %s1052_s3, 4096  ;;  %p1218_p6 = scmp.lt.s32.totalorder %s1052_s3, %s1052_s3 }
 0x11c   :  { %p1214_p5 = scmp.ne.s32.totalorder %s1052_s3, %s1213_s7  ;;  %p1219_p7 = scmp.lt.s32.totalorder %s1213_s7, %s1213_s7 }
 0x11d   :  { %376 = vmatpush1.xpose.msra.mxu0 %v1505_v1 }
 0x11e   :  { %446 = vmatpush1.xpose.msra.mxu1 %v1507_v2  ;;  %377 = vmatprep.subr.mxu0 %v1497_v53  ;;  %p1220_p8 = por %p1219_p7, %p1218_p6 }
 0x11f   :  { %447 = vmatprep.subr.mxu1 %v1499_v54 }
 0x120   :  { %p1221_p9 = pnand %p1220_p8, %p1214_p5 }
 0x121   :  { %378 = vmatpush1.xpose.msra.mxu0 %v1493_v47 }
 0x122   :  { %448 = vmatpush1.xpose.msra.mxu1 %v1495_v48  ;;  %379 = vmatprep.subr.mxu0 %v1485_v35 }
 0x123   :  { %449 = vmatprep.subr.mxu1 %v1487_v36 }
 0x125   :  { %380 = vmatpush1.xpose.msra.mxu0 %v1481_v29 }
 0x126   :  { %450 = vmatpush1.xpose.msra.mxu1 %v1483_v30  ;;  %381 = vmatprep.subr.mxu0 %v1473_v17 }
 0x127   :  { %451 = vmatprep.subr.mxu1 %v1475_v18 }
 0x129   :  { %382 = vmatpush1.xpose.msra.mxu0 %v1469_v15 }
 0x12a   :  { %452 = vmatpush1.xpose.msra.mxu1 %v1471_v16  ;;  %383 = vmatprep.subr.mxu0 %v1461_v11 }
 0x12b   :  { %453 = vmatprep.subr.mxu1 %v1463_v12 }
 0x12d   :  { %384 = vmatpush1.xpose.msra.mxu0 %v1457_v9 }
 0x12e   :  { %454 = vmatpush1.xpose.msra.mxu1 %v1459_v10  ;;  %385 = vmatprep.subr.mxu0 %v1449_v5 }
 0x12f   :  { %455 = vmatprep.subr.mxu1 %v1451_v6 }
 0x131   :  { %386 = vmatpush1.xpose.msra.mxu0 %v1445_v3 }
 0x132   :  { %456 = vmatpush1.xpose.msra.mxu1 %v1447_v4  ;;  %387 = vmatprep.subr.mxu0 %v1437_v63 }
 0x133   :  { %457 = vmatprep.subr.mxu1 %v1439_v0 }
 0x135   :  { %388 = vmatpush1.xpose.msra.mxu0 %v1433_v61 }
 0x136   :  { %458 = vmatpush1.xpose.msra.mxu1 %v1435_v62  ;;  %389 = vmatprep.subr.mxu0 %v1425_v57 }
 0x137   :  { %459 = vmatprep.subr.mxu1 %v1427_v58 }
 0x139   :  { %390 = vmatpush1.xpose.msra.mxu0 %v1421_v55 }
 0x13a   :  { %460 = vmatpush1.xpose.msra.mxu1 %v1423_v56  ;;  %391 = vmatprep.subr.mxu0 %v1413_v51 }
 0x13b   :  { %461 = vmatprep.subr.mxu1 %v1415_v52 }
 0x13d   :  { %392 = vmatpush1.xpose.msra.mxu0 %v1409_v49 }
 0x13e   :  { %462 = vmatpush1.xpose.msra.mxu1 %v1411_v50  ;;  %393 = vmatprep.subr.mxu0 %v1401_v45 }
 0x13f   :  { %463 = vmatprep.subr.mxu1 %v1403_v46 }
 0x141   :  { %394 = vmatpush1.xpose.msra.mxu0 %v1397_v43 }
 0x142   :  { %464 = vmatpush1.xpose.msra.mxu1 %v1399_v44  ;;  %395 = vmatprep.subr.mxu0 %v1389_v39 }
 0x143   :  { %465 = vmatprep.subr.mxu1 %v1391_v40 }
 0x145   :  { %396 = vmatpush1.xpose.msra.mxu0 %v1385_v37 }
 0x146   :  { %466 = vmatpush1.xpose.msra.mxu1 %v1387_v38  ;;  %397 = vmatprep.subr.mxu0 %v1377_v33 }
 0x147   :  { %467 = vmatprep.subr.mxu1 %v1379_v34 }
 0x149   :  { %398 = vmatpush1.xpose.msra.mxu0 %v1373_v31 }
 0x14a   :  { %468 = vmatpush1.xpose.msra.mxu1 %v1375_v32  ;;  %399 = vmatprep.subr.mxu0 %v1365_v27 }
 0x14b   :  { %469 = vmatprep.subr.mxu1 %v1367_v28 }
 0x14d   :  { %400 = vmatpush1.xpose.msra.mxu0 %v1361_v25 }
 0x14e   :  { %470 = vmatpush1.xpose.msra.mxu1 %v1363_v26  ;;  %401 = vmatprep.subr.mxu0 %v1788_v21 }
 0x14f   :  { %471 = vmatprep.subr.mxu1 %v1789_v59 }
 0x151   :  { %402 = vmatpush1.xpose.msra.mxu0 %v1790_v19 }
 0x152   :  { %472 = vmatpush1.xpose.msra.mxu1 %v1791_v20  ;;  %546 = vmatprep.subr.mxu0 %v513_v60 }
 0x153   :  { %691 = vmatprep.subr.mxu1 %v515_v14 }
 0x154   :  { %436 = vmatmul.mubr.f32.vlgmr.msra.gmra.mxu0 %v367_v13 }
 0x155   :  { %506 = vmatmul.mubr.f32.vlgmr.msra.gmra.mxu1 %v369_v22  ;;  %547 = vmatpush1.xpose.msra.mxu0 %v512_v24  ;;  %v1794_v22 = vld [vmem:[#allocation19_spill] sm:$0xff] }
 0x156   :  { %580 = vmatprep.mubr.f32.mxu0 %v1788_v21  ;;  %692 = vmatpush1.xpose.msra.mxu1 %v514_v23 }
 0x157   :  { %725 = vmatprep.mubr.f32.mxu1 %v1789_v59 }
 0x158   :  { %581 = vmatmul.mubr.f32.vlgmr.msra.gmra.mxu0 %v1790_v19  ;;  %v1792_v19 = vld [vmem:[#allocation15_spill] sm:$0xff] }
 0x159   :  { %726 = vmatmul.mubr.f32.vlgmr.msra.gmra.mxu1 %v1791_v20  ;;  %585 = vmatprep.mubr.f32.mxu0 %v1365_v27  ;;  %v1793_v20 = vld [vmem:[#allocation16_spill] sm:$0xff]  ;;  %v1797_v27 = vld [vmem:[#allocation18_spill] sm:$0xff] }
 0x15a   :  { %730 = vmatprep.mubr.f32.mxu1 %v1367_v28 }
 0x15c   :  { %586 = vmatmul.mubr.f32.gmra.mxu0 %v1361_v25  ;;  %v1795_v25 = vld [vmem:[#allocation20_spill] sm:$0xff] }
 0x15d   :  { %731 = vmatmul.mubr.f32.gmra.mxu1 %v1363_v26  ;;  %590 = vmatprep.mubr.f32.mxu0 %v1377_v33  ;;  %v1796_v26 = vld [vmem:[#allocation17_spill] sm:$0xff] }
 0x15e   :  { %735 = vmatprep.mubr.f32.mxu1 %v1379_v34 }
 0x160   :  { %591 = vmatmul.mubr.f32.gmra.mxu0 %v1373_v31 }
 0x161   :  { %736 = vmatmul.mubr.f32.gmra.mxu1 %v1375_v32  ;;  %595 = vmatprep.mubr.f32.mxu0 %v1389_v39 }
 0x162   :  { %740 = vmatprep.mubr.f32.mxu1 %v1391_v40 }
 0x164   :  { %596 = vmatmul.mubr.f32.gmra.mxu0 %v1385_v37 }
 0x165   :  { %741 = vmatmul.mubr.f32.gmra.mxu1 %v1387_v38  ;;  %600 = vmatprep.mubr.f32.mxu0 %v1401_v45 }
 0x166   :  { %745 = vmatprep.mubr.f32.mxu1 %v1403_v46 }
 0x168   :  { %601 = vmatmul.mubr.f32.gmra.mxu0 %v1397_v43 }
 0x169   :  { %746 = vmatmul.mubr.f32.gmra.mxu1 %v1399_v44  ;;  %605 = vmatprep.mubr.f32.mxu0 %v1413_v51 }
 0x16a   :  { %750 = vmatprep.mubr.f32.mxu1 %v1415_v52 }
 0x16c   :  { %606 = vmatmul.mubr.f32.gmra.mxu0 %v1409_v49 }
 0x16d   :  { %751 = vmatmul.mubr.f32.gmra.mxu1 %v1411_v50  ;;  %610 = vmatprep.mubr.f32.mxu0 %v1425_v57 }
 0x16e   :  { %755 = vmatprep.mubr.f32.mxu1 %v1427_v58 }
 0x170   :  { %611 = vmatmul.mubr.f32.gmra.mxu0 %v1421_v55 }
 0x171   :  { %756 = vmatmul.mubr.f32.gmra.mxu1 %v1423_v56  ;;  %615 = vmatprep.mubr.f32.mxu0 %v1437_v63 }
 0x172   :  { %760 = vmatprep.mubr.f32.mxu1 %v1439_v0 }
 0x174   :  { %616 = vmatmul.mubr.f32.gmra.mxu0 %v1433_v61 }
 0x175   :  { %761 = vmatmul.mubr.f32.gmra.mxu1 %v1435_v62  ;;  %620 = vmatprep.mubr.f32.mxu0 %v1449_v5 }
 0x176   :  { %765 = vmatprep.mubr.f32.mxu1 %v1451_v6 }
 0x178   :  { %621 = vmatmul.mubr.f32.gmra.mxu0 %v1445_v3 }
 0x179   :  { %766 = vmatmul.mubr.f32.gmra.mxu1 %v1447_v4  ;;  %625 = vmatprep.mubr.f32.mxu0 %v1461_v11 }
 0x17a   :  { %770 = vmatprep.mubr.f32.mxu1 %v1463_v12 }
 0x17c   :  { %626 = vmatmul.mubr.f32.gmra.mxu0 %v1457_v9 }
 0x17d   :  { %771 = vmatmul.mubr.f32.gmra.mxu1 %v1459_v10  ;;  %630 = vmatprep.mubr.f32.mxu0 %v1473_v17 }
 0x17e   :  { %775 = vmatprep.mubr.f32.mxu1 %v1475_v18 }
 0x180   :  { %631 = vmatmul.mubr.f32.gmra.mxu0 %v1469_v15 }
 0x181   :  { %776 = vmatmul.mubr.f32.gmra.mxu1 %v1471_v16  ;;  %635 = vmatprep.mubr.f32.mxu0 %v1485_v35 }
 0x182   :  { %780 = vmatprep.mubr.f32.mxu1 %v1487_v36 }
 0x184   :  { %636 = vmatmul.mubr.f32.gmra.mxu0 %v1481_v29 }
 0x185   :  { %781 = vmatmul.mubr.f32.gmra.mxu1 %v1483_v30  ;;  %640 = vmatprep.mubr.f32.mxu0 %v1497_v53 }
 0x186   :  { %785 = vmatprep.mubr.f32.mxu1 %v1499_v54 }
 0x188   :  { %641 = vmatmul.mubr.f32.gmra.mxu0 %v1493_v47 }
 0x189   :  { %786 = vmatmul.mubr.f32.gmra.mxu1 %v1495_v48  ;;  %645 = vmatprep.mubr.f32.mxu0 %v1509_v7 }
 0x18a   :  { %790 = vmatprep.mubr.f32.mxu1 %v1511_v8 }
 0x18c   :  { %646 = vmatmul.mubr.f32.gmra.mxu0 %v1505_v1 }
 0x18d   :  { %791 = vmatmul.mubr.f32.gmra.mxu1 %v1507_v2  ;;  %650 = vmatprep.mubr.f32.mxu0 %v1521_v41 }
 0x18e   :  { %795 = vmatprep.mubr.f32.mxu1 %v1523_v42 }
 0x190   :  { %651 = vmatmul.mubr.f32.gmra.mxu0 %v1792_v19 }
 0x191   :  { %796 = vmatmul.mubr.f32.gmra.mxu1 %v1793_v20  ;;  %655 = vmatprep.mubr.f32.mxu0 %v1794_v22 }
 0x192   :  { %800 = vmatprep.mubr.f32.mxu1 %v1795_v25 }
 0x194   :  { %656 = vmatmul.mubr.f32.gmra.mxu0 %v1796_v26 }
 0x195   :  { %801 = vmatmul.mubr.f32.gmra.mxu1 %v1797_v27 }
 0x196   :  { %1224 = shalt.err (!%p1221_p9)
}
 0x197   :  { %s1262_s8 = smov 256   ;;  %s1263_s9 = smov 16  }
 0x198   :  { %1057 = dma.vmem_to_hbm [thread:$0]  %s1052_s3, 4096, %s1761_s4, [#allocation4], %s1262_s8, %s1262_s8, %s1263_s9  }
 0x199   :  { %s1264_s12 = smov [#allocation6]  }
 0x19a   :  { %s1064_s13 = sshll.u32 %s1264_s12, 4  ;;  %s1065_s13 = int_to_ptr.vmem [resolvable:$true] %s1064_s13 }
 0x19b   :  { %s1233_s14 = scalar_lea.vmem %s1065_s13, 128  ;;  %p1238_p11 = scmp.lt.s32.totalorder %s1065_s13, %s1065_s13 }
 0x19c   :  { %p1234_p10 = scmp.ne.s32.totalorder %s1065_s13, %s1233_s14  ;;  %p1239_p12 = scmp.lt.s32.totalorder %s1233_s14, %s1233_s14 }
 0x19e   :  { %p1240_p13 = por %p1239_p12, %p1238_p11 }
 0x1a0   :  { %p1241_p0 = pnand %p1240_p13, %p1234_p10 }
 0x214   :  { %v437_v28 = vpop.f32.mrf.mxu0 }
 0x215   :  { %v507_v31 = vpop.f32.mrf.mxu1 }
 0x216   :  { %v508_v32 = vadd.f32 %v507_v31, %v437_v28  ;;  %v439_v33 = vpop.f32.mrf.mxu0 }
 0x217   :  { %v509_v34 = vpop.f32.mrf.mxu1 }
 0x218   :  { %511 = vst [vmem:[#allocation6] sm:$0xff] %v508_v32  ;;  %v582_v37 = vpop.f32.mrf.mxu0 }
 0x219   :  { %1244 = shalt.err (!%p1241_p0)
}
 0x21a   :  { %1067 = dma.vmem_to_hbm [thread:$0]  %s1065_s13, 128, %s1762_s5, [#allocation7]   ;;  %v727_v38 = vpop.f32.mrf.mxu1  ;;  %v584_v40 = vpop.f32.mrf.mxu0 }
 0x21b   :  { %v728_v39 = vadd.f32 %v727_v38, %v582_v37 }
 0x21c   :  { %v729_v43 = vpop.f32.mrf.mxu1  ;;  %v587_v44 = vpop.f32.mrf.mxu0 }
 0x21d   :  { %806 = vst.msk [vmem:[%s1763_s6] sm:$0xff] %vm103_vm1, %v728_v39 }
 0x21e   :  { %v732_v45 = vpop.f32.mrf.mxu1  ;;  %v589_v49 = vpop.f32.mrf.mxu0 }
 0x21f   :  { %v733_v46 = vadd.f32 %v732_v45, %v587_v44 }
 0x220   :  { %v734_v50 = vpop.f32.mrf.mxu1  ;;  %v592_v51 = vpop.f32.mrf.mxu0 }
 0x221   :  { %807 = vst.msk [vmem:[%s1763_s6 + $0x8] sm:$0xff] %vm103_vm1, %v733_v46 }
 0x222   :  { %v737_v52 = vpop.f32.mrf.mxu1  ;;  %v594_v56 = vpop.f32.mrf.mxu0 }
 0x223   :  { %v738_v55 = vadd.f32 %v737_v52, %v592_v51 }
 0x224   :  { %v739_v57 = vpop.f32.mrf.mxu1  ;;  %v597_v58 = vpop.f32.mrf.mxu0 }
 0x225   :  { %808 = vst.msk [vmem:[%s1763_s6 + $0x10] sm:$0xff] %vm103_vm1, %v738_v55 }
 0x226   :  { %v742_v61 = vpop.f32.mrf.mxu1  ;;  %v599_v63 = vpop.f32.mrf.mxu0 }
 0x227   :  { %v743_v62 = vadd.f32 %v742_v61, %v597_v58 }
 0x228   :  { %v744_v0 = vpop.f32.mrf.mxu1  ;;  %v602_v3 = vpop.f32.mrf.mxu0 }
 0x229   :  { %809 = vst.msk [vmem:[%s1763_s6 + $0x18] sm:$0xff] %vm103_vm1, %v743_v62 }
 0x22a   :  { %v747_v4 = vpop.f32.mrf.mxu1  ;;  %v604_v6 = vpop.f32.mrf.mxu0 }
 0x22b   :  { %v748_v5 = vadd.f32 %v747_v4, %v602_v3 }
 0x22c   :  { %v749_v9 = vpop.f32.mrf.mxu1  ;;  %v607_v10 = vpop.f32.mrf.mxu0 }
 0x22d   :  { %810 = vst.msk [vmem:[%s1763_s6 + $0x20] sm:$0xff] %vm103_vm1, %v748_v5 }
 0x22e   :  { %v752_v11 = vpop.f32.mrf.mxu1  ;;  %v609_v15 = vpop.f32.mrf.mxu0 }
 0x22f   :  { %v753_v12 = vadd.f32 %v752_v11, %v607_v10 }
 0x230   :  { %v754_v16 = vpop.f32.mrf.mxu1  ;;  %v612_v17 = vpop.f32.mrf.mxu0 }
 0x231   :  { %811 = vst.msk [vmem:[%s1763_s6 + $0x28] sm:$0xff] %vm103_vm1, %v753_v12 }
 0x232   :  { %v757_v18 = vpop.f32.mrf.mxu1  ;;  %v614_v30 = vpop.f32.mrf.mxu0 }
 0x233   :  { %v758_v29 = vadd.f32 %v757_v18, %v612_v17 }
 0x234   :  { %v759_v35 = vpop.f32.mrf.mxu1  ;;  %v617_v36 = vpop.f32.mrf.mxu0 }
 0x235   :  { %812 = vst.msk [vmem:[%s1763_s6 + $0x30] sm:$0xff] %vm103_vm1, %v758_v29 }
 0x236   :  { %v762_v47 = vpop.f32.mrf.mxu1  ;;  %v619_v53 = vpop.f32.mrf.mxu0 }
 0x237   :  { %v763_v48 = vadd.f32 %v762_v47, %v617_v36 }
 0x238   :  { %v764_v54 = vpop.f32.mrf.mxu1  ;;  %v622_v1 = vpop.f32.mrf.mxu0 }
 0x239   :  { %813 = vst.msk [vmem:[%s1763_s6 + $0x38] sm:$0xff] %vm103_vm1, %v763_v48 }
 0x23a   :  { %v767_v2 = vpop.f32.mrf.mxu1  ;;  %v624_v8 = vpop.f32.mrf.mxu0 }
 0x23b   :  { %v768_v7 = vadd.f32 %v767_v2, %v622_v1 }
 0x23c   :  { %v769_v23 = vpop.f32.mrf.mxu1  ;;  %v627_v24 = vpop.f32.mrf.mxu0 }
 0x23d   :  { %814 = vst.msk [vmem:[%s1763_s6 + $0x40] sm:$0xff] %vm103_vm1, %v768_v7 }
 0x23e   :  { %v772_v41 = vpop.f32.mrf.mxu1  ;;  %v629_v13 = vpop.f32.mrf.mxu0 }
 0x23f   :  { %v773_v42 = vadd.f32 %v772_v41, %v627_v24 }
 0x240   :  { %v774_v21 = vpop.f32.mrf.mxu1  ;;  %v632_v59 = vpop.f32.mrf.mxu0 }
 0x241   :  { %815 = vst.msk [vmem:[%s1763_s6 + $0x48] sm:$0xff] %vm103_vm1, %v773_v42 }
 0x242   :  { %v777_v60 = vpop.f32.mrf.mxu1  ;;  %v634_v19 = vpop.f32.mrf.mxu0 }
 0x243   :  { %v778_v14 = vadd.f32 %v777_v60, %v632_v59 }
 0x244   :  { %v779_v20 = vpop.f32.mrf.mxu1  ;;  %v637_v22 = vpop.f32.mrf.mxu0 }
 0x245   :  { %816 = vst.msk [vmem:[%s1763_s6 + $0x50] sm:$0xff] %vm103_vm1, %v778_v14 }
 0x246   :  { %v782_v25 = vpop.f32.mrf.mxu1  ;;  %v639_v27 = vpop.f32.mrf.mxu0 }
 0x247   :  { %v783_v26 = vadd.f32 %v782_v25, %v637_v22 }
 0x248   :  { %v784_v28 = vpop.f32.mrf.mxu1  ;;  %v642_v31 = vpop.f32.mrf.mxu0 }
 0x249   :  { %817 = vst.msk [vmem:[%s1763_s6 + $0x58] sm:$0xff] %vm103_vm1, %v783_v26 }
 0x24a   :  { %v787_v32 = vpop.f32.mrf.mxu1  ;;  %v644_v34 = vpop.f32.mrf.mxu0 }
 0x24b   :  { %v788_v33 = vadd.f32 %v787_v32, %v642_v31 }
 0x24c   :  { %v789_v37 = vpop.f32.mrf.mxu1  ;;  %v647_v38 = vpop.f32.mrf.mxu0 }
 0x24d   :  { %818 = vst.msk [vmem:[%s1763_s6 + $0x60] sm:$0xff] %vm103_vm1, %v788_v33 }
 0x24e   :  { %v792_v39 = vpop.f32.mrf.mxu1  ;;  %v649_v43 = vpop.f32.mrf.mxu0 }
 0x24f   :  { %v793_v40 = vadd.f32 %v792_v39, %v647_v38 }
 0x250   :  { %v794_v44 = vpop.f32.mrf.mxu1  ;;  %v652_v45 = vpop.f32.mrf.mxu0 }
 0x251   :  { %819 = vst.msk [vmem:[%s1763_s6 + $0x68] sm:$0xff] %vm103_vm1, %v793_v40 }
 0x252   :  { %v797_v46 = vpop.f32.mrf.mxu1  ;;  %v654_v50 = vpop.f32.mrf.mxu0 }
 0x253   :  { %v798_v49 = vadd.f32 %v797_v46, %v652_v45 }
 0x254   :  { %v799_v51 = vpop.f32.mrf.mxu1  ;;  %v657_v52 = vpop.f32.mrf.mxu0 }
 0x255   :  { %820 = vst.msk [vmem:[%s1763_s6 + $0x70] sm:$0xff] %vm103_vm1, %v798_v49 }
 0x256   :  { %v802_v55 = vpop.f32.mrf.mxu1  ;;  %v659_v57 = vpop.f32.mrf.mxu0 }
 0x257   :  { %v803_v56 = vadd.f32 %v802_v55, %v657_v52 }
 0x258   :  { %v804_v58 = vpop.f32.mrf.mxu1 }
 0x259   :  { %821 = vst.msk [vmem:[%s1763_s6 + $0x78] sm:$0xff] %vm103_vm1, %v803_v56 }
 0x25a   :  { %1255 = dma.done.wait [#allocation4], 4096  }
 0x25b   :  { %1256 = vsyncadd [#allocation4], 4294963200 }
 0x25c   :  { %1257 = dma.done.wait [#allocation7], 128  }
 0x25d   :  { %1258 = vsyncadd [#allocation7], 4294967168 }
 0x25e   :  { %1078 = vsyncpa [#allocation3], 1 }
 0x25f   :  { %1079 = vsyncpa [#allocation4], 1 }
 0x260   :  { %1080 = vsyncpa [#allocation7], 1 }

</bundles_post_ra>
